<compile_context>
chip_gen: v6e
topology: v6e:2x2x1
jax: 0.10.0
libtpu: 0.0.40
codegen_flags: <defaults>
</compile_context>

<pallas_src>
import jax
import jax.numpy as jnp
from jax.experimental import pallas as pl
from jax.experimental.pallas import tpu as pltpu


# ----------------------------- Pallas kernel --------------------------------

def clustering_kernel(x_ref, wbb_ref, bbb_ref, wc1_ref, bc1_ref,
                      wc2_ref, bc2_ref, wcl_ref, bcl_ref,
                      fb_ref, fc_ref, cl_ref):
    """One batch tile: backbone Linear, contrastive MLP + L2-norm, packed cluster heads."""
    x = x_ref[...]                                                    # (bb, IN)

    # Backbone stand-in: Linear(IN -> D).                              (bb, D)
    fb = jnp.dot(x, wbb_ref[...], preferred_element_type=jnp.float32) + bbb_ref[...]

    # Contrastive head: Linear(D, D) -> ReLU -> Linear(D, DC).         (bb, DC)
    h = jnp.maximum(
        jnp.dot(fb, wc1_ref[...], preferred_element_type=jnp.float32) + bc1_ref[...],
        0.0)
    fc = jnp.dot(h, wc2_ref[...], preferred_element_type=jnp.float32) + bc2_ref[...]

    # F.normalize(fc, dim=-1): x / max(||x||_2, eps).
    ss = jnp.sum(fc * fc, axis=-1, keepdims=True)                     # (bb, 1)
    denom = jnp.maximum(jnp.sqrt(ss), 1e-12)
    fc_n = fc / denom

    # All cluster heads at once: weights packed along the lane axis.   (bb, NH*CPAD)
    cl = jnp.dot(fb, wcl_ref[...], preferred_element_type=jnp.float32) + bcl_ref[...]

    fb_ref[...] = fb
    fc_ref[...] = fc_n
    cl_ref[...] = cl


# ------------------------------- wrapper -------------------------------------

def pack_cluster_heads(w_heads, b_heads, cpad):
    """Pack per-head (D, ncl) weights into one lane-dense (D, nheads*cpad) matrix."""
    nheads, d, ncl = w_heads.shape
    wcl = jnp.zeros((d, nheads * cpad), jnp.float32)
    bcl = jnp.zeros((1, nheads * cpad), jnp.float32)
    for hh in range(nheads):
        wcl = wcl.at[:, hh * cpad:hh * cpad + ncl].set(w_heads[hh])
        bcl = bcl.at[0, hh * cpad:hh * cpad + ncl].set(b_heads[hh])
    return wcl, bcl


def clustering_forward(x_nchw, params, *, nheads, nclusters, cpad=128, bb=8):
    """Pallas implementation of ClusteringModel.forward(x, forward_all=True)."""
    wbb, bbb, wc1, bc1, wc2, bc2, w_heads, b_heads = params
    wcl, bcl = pack_cluster_heads(w_heads, b_heads, cpad)

    B = x_nchw.shape[0]
    in_dim = wbb.shape[0]
    d = wbb.shape[1]
    dc = wc2.shape[1]
    ncl_packed = nheads * cpad

    # Lane-dense input DMA: one contiguous (bb, C*H*W) slab per grid step.
    x_flat = x_nchw.reshape(B, -1).astype(jnp.float32)
    bp = pl.cdiv(B, bb) * bb
    if bp != B:
        x_flat = jnp.pad(x_flat, ((0, bp - B), (0, 0)))

    def full(shape):
        return pl.BlockSpec(shape, lambda i, _n=len(shape): (0,) * _n)

    fb, fcn, cl = pl.pallas_call(
        clustering_kernel,
        out_shape=(jax.ShapeDtypeStruct((bp, d), jnp.float32),
                   jax.ShapeDtypeStruct((bp, dc), jnp.float32),
                   jax.ShapeDtypeStruct((bp, ncl_packed), jnp.float32)),
        grid_spec=pltpu.PrefetchScalarGridSpec(
            num_scalar_prefetch=0,
            grid=(bp // bb,),
            in_specs=[
                pl.BlockSpec((bb, in_dim), lambda i: (i, 0)),
                full(wbb.shape), full(bbb.shape),
                full(wc1.shape), full(bc1.shape),
                full(wc2.shape), full(bc2.shape),
                full(wcl.shape), full(bcl.shape),
            ],
            out_specs=[
                pl.BlockSpec((bb, d), lambda i: (i, 0)),
                pl.BlockSpec((bb, dc), lambda i: (i, 0)),
                pl.BlockSpec((bb, ncl_packed), lambda i: (i, 0)),
            ],
        ),
        compiler_params=pltpu.CompilerParams(
            dimension_semantics=("parallel",)),
    )(x_flat, wbb, bbb, wc1, bc1, wc2, bc2, wcl, bcl)

    fb = fb[:B]
    fcn = fcn[:B]
    cl = cl[:B].reshape(B, nheads, cpad)[:, :, :nclusters]
    out_clusters = [cl[:, hh, :] for hh in range(nheads)]
    # TODO(synk): MlpNet multi-layer heads (heads_layers>1), contrastive_head='linear',
    #             norm_features=True and the 'neighbors' reshape path are not implemented.
    return {"out_clusters": out_clusters,
            "features_backbone": fb,
            "features_contrastive": fcn}


# -------------------------- params & pure-JAX reference ----------------------

def make_params(key, *, in_dim, backbone_dim, contrastive_dim, nheads, nclusters):
    """Deterministic synthetic parameters (rounded to bf16-exact values so the
    comparison against the XLA reference is independent of matmul precision)."""
    ks = jax.random.split(key, 8)

    def rnd(k, shape, scale):
        w = scale * jax.random.normal(k, shape, jnp.float32)
        return w.astype(jnp.bfloat16).astype(jnp.float32)

    wbb = rnd(ks[0], (in_dim, backbone_dim), 1.0 / float(in_dim) ** 0.5)
    bbb = rnd(ks[1], (1, backbone_dim), 0.1)
    wc1 = rnd(ks[2], (backbone_dim, backbone_dim), 1.0 / float(backbone_dim) ** 0.5)
    bc1 = rnd(ks[3], (1, backbone_dim), 0.1)
    wc2 = rnd(ks[4], (backbone_dim, contrastive_dim), 1.0 / float(backbone_dim) ** 0.5)
    bc2 = rnd(ks[5], (1, contrastive_dim), 0.1)
    w_heads = rnd(ks[6], (nheads, backbone_dim, nclusters), 1.0 / float(backbone_dim) ** 0.5)
    b_heads = rnd(ks[7], (nheads, nclusters), 0.1)
    return (wbb, bbb, wc1, bc1, wc2, bc2, w_heads, b_heads)


def ref_forward(x_nchw, params):
    """Pure-JAX reference mirroring the PyTorch ClusteringModel.forward."""
    wbb, bbb, wc1, bc1, wc2, bc2, w_heads, b_heads = params
    B = x_nchw.shape[0]
    xf = x_nchw.reshape(B, -1).astype(jnp.float32)
    fb = xf @ wbb + bbb
    h = jnp.maximum(fb @ wc1 + bc1, 0.0)
    fc = h @ wc2 + bc2
    norm = jnp.sqrt(jnp.sum(fc * fc, axis=-1, keepdims=True))
    fcn = fc / jnp.maximum(norm, 1e-12)
    out_clusters = [fb @ w_heads[hh] + b_heads[hh][None, :]
                    for hh in range(w_heads.shape[0])]
    return {"out_clusters": out_clusters,
            "features_backbone": fb,
            "features_contrastive": fcn}


# --------------------------------- main --------------------------------------

if __name__ == "__main__":
    B, C, H, W = 2, 4, 16, 16
    D, DC = 128, 128            # backbone_dim, contrastive_dim (lane-dense choices)
    NHEADS, NCL = 2, 10         # nheads, nclusters

    key = jax.random.PRNGKey(0)
    k_x, k_p = jax.random.split(key)
    params = make_params(k_p, in_dim=C * H * W, backbone_dim=D,
                         contrastive_dim=DC, nheads=NHEADS, nclusters=NCL)
    x = jax.random.normal(k_x, (B, C, H, W), jnp.float32)
    x = x.astype(jnp.bfloat16).astype(jnp.float32)   # bf16-exact inputs

    out = clustering_forward(x, params, nheads=NHEADS, nclusters=NCL)
    out = jax.block_until_ready(out)

    ref = ref_forward(x, params)

    assert len(out["out_clusters"]) == NHEADS
    for a, b in zip(out["out_clusters"], ref["out_clusters"]):
        assert a.shape == (B, NCL)
        assert jnp.allclose(a, b, atol=1e-4, rtol=1e-4), "cluster head mismatch"
    assert out["features_backbone"].shape == (B, D)
    assert jnp.allclose(out["features_backbone"], ref["features_backbone"],
                        atol=1e-4, rtol=1e-4), "backbone features mismatch"
    assert out["features_contrastive"].shape == (B, DC)
    assert jnp.allclose(out["features_contrastive"], ref["features_contrastive"],
                        atol=1e-4, rtol=1e-4), "contrastive features mismatch"
    # contrastive features are unit-norm
    assert jnp.allclose(jnp.sum(out["features_contrastive"] ** 2, axis=-1), 1.0,
                        atol=1e-3)

    print("KERNEL_OK")
</pallas_src>

<mosaic_0001>
module attributes {stable_mosaic.version = 11 : i64} {
  func.func @clustering_kernel(%arg0: i32, %arg1: memref<8x1024xf32, #tpu.memory_space<vmem>>, %arg2: memref<1024x128xf32, #tpu.memory_space<vmem>>, %arg3: memref<1x128xf32, #tpu.memory_space<vmem>>, %arg4: memref<128x128xf32, #tpu.memory_space<vmem>>, %arg5: memref<1x128xf32, #tpu.memory_space<vmem>>, %arg6: memref<128x128xf32, #tpu.memory_space<vmem>>, %arg7: memref<1x128xf32, #tpu.memory_space<vmem>>, %arg8: memref<128x256xf32, #tpu.memory_space<vmem>>, %arg9: memref<1x256xf32, #tpu.memory_space<vmem>>, %arg10: memref<8x128xf32, #tpu.memory_space<vmem>>, %arg11: memref<8x128xf32, #tpu.memory_space<vmem>>, %arg12: memref<8x256xf32, #tpu.memory_space<vmem>>) attributes {dimension_semantics = [#tpu.dimension_semantics<parallel>], iteration_bounds = array<i64: 1>, scalar_prefetch = 0 : i64, scratch_operands = 0 : i64, tpu.core_type = #tpu.core_type<tc>, window_params = [{transform_indices = @transform_0, window_bounds = array<i64: 8, 1024>}, {pipeline_mode = #tpu.pipeline_mode<synchronous>, transform_indices = @transform_1, window_bounds = array<i64: 1024, 128>}, {pipeline_mode = #tpu.pipeline_mode<synchronous>, transform_indices = @transform_2, window_bounds = array<i64: 1, 128>}, {pipeline_mode = #tpu.pipeline_mode<synchronous>, transform_indices = @transform_3, window_bounds = array<i64: 128, 128>}, {pipeline_mode = #tpu.pipeline_mode<synchronous>, transform_indices = @transform_4, window_bounds = array<i64: 1, 128>}, {pipeline_mode = #tpu.pipeline_mode<synchronous>, transform_indices = @transform_5, window_bounds = array<i64: 128, 128>}, {pipeline_mode = #tpu.pipeline_mode<synchronous>, transform_indices = @transform_6, window_bounds = array<i64: 1, 128>}, {pipeline_mode = #tpu.pipeline_mode<synchronous>, transform_indices = @transform_7, window_bounds = array<i64: 128, 256>}, {pipeline_mode = #tpu.pipeline_mode<synchronous>, transform_indices = @transform_8, window_bounds = array<i64: 1, 256>}, {transform_indices = @transform_9, window_bounds = array<i64: 8, 128>}, {transform_indices = @transform_10, window_bounds = array<i64: 8, 128>}, {transform_indices = @transform_11, window_bounds = array<i64: 8, 256>}]} {
    %c0 = arith.constant 0 : index
    %c0_0 = arith.constant 0 : index
    %0 = vector.load %arg1[%c0, %c0_0] : memref<8x1024xf32, #tpu.memory_space<vmem>>, vector<8x1024xf32>
    %c0_1 = arith.constant 0 : index
    %c0_2 = arith.constant 0 : index
    %1 = vector.load %arg2[%c0_1, %c0_2] : memref<1024x128xf32, #tpu.memory_space<vmem>>, vector<1024x128xf32>
    %cst = arith.constant dense<0.000000e+00> : vector<8x128xf32>
    %2 = tpu.matmul %0, %1, %cst {dimension_numbers = #tpu.dot_dimension_numbers<[1], [0], [0], [1], [0, 0, 1, 1], [], []>} : vector<8x1024xf32>, vector<1024x128xf32>, vector<8x128xf32> -> vector<8x128xf32>
    %c0_3 = arith.constant 0 : index
    %c0_4 = arith.constant 0 : index
    %3 = vector.load %arg3[%c0_3, %c0_4] : memref<1x128xf32, #tpu.memory_space<vmem>>, vector<1x128xf32>
    %4 = vector.broadcast %3 : vector<1x128xf32> to vector<8x128xf32>
    %5 = arith.addf %2, %4 : vector<8x128xf32>
    %c0_5 = arith.constant 0 : index
    %c0_6 = arith.constant 0 : index
    %6 = vector.load %arg4[%c0_5, %c0_6] : memref<128x128xf32, #tpu.memory_space<vmem>>, vector<128x128xf32>
    %cst_7 = arith.constant dense<0.000000e+00> : vector<8x128xf32>
    %7 = tpu.matmul %5, %6, %cst_7 {dimension_numbers = #tpu.dot_dimension_numbers<[1], [0], [0], [1], [0, 0, 1, 1], [], []>} : vector<8x128xf32>, vector<128x128xf32>, vector<8x128xf32> -> vector<8x128xf32>
    %c0_8 = arith.constant 0 : index
    %c0_9 = arith.constant 0 : index
    %8 = vector.load %arg5[%c0_8, %c0_9] : memref<1x128xf32, #tpu.memory_space<vmem>>, vector<1x128xf32>
    %9 = vector.broadcast %8 : vector<1x128xf32> to vector<8x128xf32>
    %10 = arith.addf %7, %9 : vector<8x128xf32>
    %cst_10 = arith.constant 0.000000e+00 : f32
    %11 = vector.broadcast %cst_10 : f32 to vector<8x128xf32>
    %12 = arith.maximumf %10, %11 : vector<8x128xf32>
    %c0_11 = arith.constant 0 : index
    %c0_12 = arith.constant 0 : index
    %13 = vector.load %arg6[%c0_11, %c0_12] : memref<128x128xf32, #tpu.memory_space<vmem>>, vector<128x128xf32>
    %cst_13 = arith.constant dense<0.000000e+00> : vector<8x128xf32>
    %14 = tpu.matmul %12, %13, %cst_13 {dimension_numbers = #tpu.dot_dimension_numbers<[1], [0], [0], [1], [0, 0, 1, 1], [], []>} : vector<8x128xf32>, vector<128x128xf32>, vector<8x128xf32> -> vector<8x128xf32>
    %c0_14 = arith.constant 0 : index
    %c0_15 = arith.constant 0 : index
    %15 = vector.load %arg7[%c0_14, %c0_15] : memref<1x128xf32, #tpu.memory_space<vmem>>, vector<1x128xf32>
    %16 = vector.broadcast %15 : vector<1x128xf32> to vector<8x128xf32>
    %17 = arith.addf %14, %16 : vector<8x128xf32>
    %18 = arith.mulf %17, %17 : vector<8x128xf32>
    %cst_16 = arith.constant dense<0.000000e+00> : vector<8xf32>
    %19 = vector.multi_reduction <add>, %18, %cst_16 [1] : vector<8x128xf32> to vector<8xf32>
    %20 = vector.shape_cast %19 : vector<8xf32> to vector<8x1xf32>
    %21 = math.sqrt %20 : vector<8x1xf32>
    %cst_17 = arith.constant 9.99999996E-13 : f32
    %22 = vector.broadcast %cst_17 : f32 to vector<8x1xf32>
    %23 = arith.maximumf %21, %22 : vector<8x1xf32>
    %24 = vector.broadcast %23 : vector<8x1xf32> to vector<8x128xf32>
    %25 = arith.divf %17, %24 : vector<8x128xf32>
    %c0_18 = arith.constant 0 : index
    %c0_19 = arith.constant 0 : index
    %26 = vector.load %arg8[%c0_18, %c0_19] : memref<128x256xf32, #tpu.memory_space<vmem>>, vector<128x256xf32>
    %cst_20 = arith.constant dense<0.000000e+00> : vector<8x256xf32>
    %27 = tpu.matmul %5, %26, %cst_20 {dimension_numbers = #tpu.dot_dimension_numbers<[1], [0], [0], [1], [0, 0, 1, 1], [], []>} : vector<8x128xf32>, vector<128x256xf32>, vector<8x256xf32> -> vector<8x256xf32>
    %c0_21 = arith.constant 0 : index
    %c0_22 = arith.constant 0 : index
    %28 = vector.load %arg9[%c0_21, %c0_22] : memref<1x256xf32, #tpu.memory_space<vmem>>, vector<1x256xf32>
    %29 = vector.broadcast %28 : vector<1x256xf32> to vector<8x256xf32>
    %30 = arith.addf %27, %29 : vector<8x256xf32>
    %c0_23 = arith.constant 0 : index
    %c0_24 = arith.constant 0 : index
    %31 = vector.load %arg10[%c0_23, %c0_24] : memref<8x128xf32, #tpu.memory_space<vmem>>, vector<8x128xf32>
    tpu.vector_store %arg10[%c0_23, %c0_24], %5 {strides = array<i32>} : memref<8x128xf32, #tpu.memory_space<vmem>>, vector<8x128xf32>,
    %c0_25 = arith.constant 0 : index
    %c0_26 = arith.constant 0 : index
    %32 = vector.load %arg11[%c0_25, %c0_26] : memref<8x128xf32, #tpu.memory_space<vmem>>, vector<8x128xf32>
    tpu.vector_store %arg11[%c0_25, %c0_26], %25 {strides = array<i32>} : memref<8x128xf32, #tpu.memory_space<vmem>>, vector<8x128xf32>,
    %c0_27 = arith.constant 0 : index
    %c0_28 = arith.constant 0 : index
    %33 = vector.load %arg12[%c0_27, %c0_28] : memref<8x256xf32, #tpu.memory_space<vmem>>, vector<8x256xf32>
    tpu.vector_store %arg12[%c0_27, %c0_28], %30 {strides = array<i32>} : memref<8x256xf32, #tpu.memory_space<vmem>>, vector<8x256xf32>,
    return
  }
  func.func @transform_0(%arg0: i32) -> (i32, i32) {
    %c0_i32 = arith.constant 0 : i32
    %c0_i32_0 = arith.constant 0 : i32
    return %arg0, %c0_i32 : i32, i32
  }
  func.func @transform_1(%arg0: i32) -> (i32, i32) {
    %c0_i32 = arith.constant 0 : i32
    %c0_i32_0 = arith.constant 0 : i32
    %c0_i32_1 = arith.constant 0 : i32
    return %c0_i32, %c0_i32_0 : i32, i32
  }
  func.func @transform_2(%arg0: i32) -> (i32, i32) {
    %c0_i32 = arith.constant 0 : i32
    %c0_i32_0 = arith.constant 0 : i32
    %c0_i32_1 = arith.constant 0 : i32
    return %c0_i32, %c0_i32_0 : i32, i32
  }
  func.func @transform_3(%arg0: i32) -> (i32, i32) {
    %c0_i32 = arith.constant 0 : i32
    %c0_i32_0 = arith.constant 0 : i32
    %c0_i32_1 = arith.constant 0 : i32
    return %c0_i32, %c0_i32_0 : i32, i32
  }
  func.func @transform_4(%arg0: i32) -> (i32, i32) {
    %c0_i32 = arith.constant 0 : i32
    %c0_i32_0 = arith.constant 0 : i32
    %c0_i32_1 = arith.constant 0 : i32
    return %c0_i32, %c0_i32_0 : i32, i32
  }
  func.func @transform_5(%arg0: i32) -> (i32, i32) {
    %c0_i32 = arith.constant 0 : i32
    %c0_i32_0 = arith.constant 0 : i32
    %c0_i32_1 = arith.constant 0 : i32
    return %c0_i32, %c0_i32_0 : i32, i32
  }
  func.func @transform_6(%arg0: i32) -> (i32, i32) {
    %c0_i32 = arith.constant 0 : i32
    %c0_i32_0 = arith.constant 0 : i32
    %c0_i32_1 = arith.constant 0 : i32
    return %c0_i32, %c0_i32_0 : i32, i32
  }
  func.func @transform_7(%arg0: i32) -> (i32, i32) {
    %c0_i32 = arith.constant 0 : i32
    %c0_i32_0 = arith.constant 0 : i32
    %c0_i32_1 = arith.constant 0 : i32
    return %c0_i32, %c0_i32_0 : i32, i32
  }
  func.func @transform_8(%arg0: i32) -> (i32, i32) {
    %c0_i32 = arith.constant 0 : i32
    %c0_i32_0 = arith.constant 0 : i32
    %c0_i32_1 = arith.constant 0 : i32
    return %c0_i32, %c0_i32_0 : i32, i32
  }
  func.func @transform_9(%arg0: i32) -> (i32, i32) {
    %c0_i32 = arith.constant 0 : i32
    %c0_i32_0 = arith.constant 0 : i32
    return %arg0, %c0_i32 : i32, i32
  }
  func.func @transform_10(%arg0: i32) -> (i32, i32) {
    %c0_i32 = arith.constant 0 : i32
    %c0_i32_0 = arith.constant 0 : i32
    return %arg0, %c0_i32 : i32, i32
  }
  func.func @transform_11(%arg0: i32) -> (i32, i32) {
    %c0_i32 = arith.constant 0 : i32
    %c0_i32_0 = arith.constant 0 : i32
    return %arg0, %c0_i32 : i32, i32
  }
}

</mosaic_0001>

<bundles_post_ra>
// kernel: tpu_custom_call.1
= control target key start
LH: loop header
LB: loop body
LE: loop exit
PB: predicated region body
PF: predicated region fallthrough
CT: control target
= control target key end

     0   :  { %17 = vsyncpa [#allocation3], 0  ;;  %s1483_s0 = inlined_call_operand.hbm [shape: f32[8,1024], index: 0, kind: input, shape index: {}]   ;;  %s1484_s1 = inlined_call_operand.hbm [shape: f32[1024,128], index: 1, kind: input, shape index: {}]   ;;  %s1485_s2 = inlined_call_operand.vmem [shape: f32[1,128], index: 2, kind: input, shape index: {}]   ;;  %s1486_s3 = inlined_call_operand.hbm [shape: f32[128,128], index: 3, kind: input, shape index: {}]   ;;  %s1487_s4 = inlined_call_operand.vmem [shape: f32[1,128], index: 4, kind: input, shape index: {}]   ;;  %s1488_s5 = inlined_call_operand.hbm [shape: f32[128,128], index: 5, kind: input, shape index: {}]   ;;  %s1489_s6 = inlined_call_operand.vmem [shape: f32[1,128], index: 6, kind: input, shape index: {}]   ;;  %s1490_s7 = inlined_call_operand.hbm [shape: f32[128,256], index: 7, kind: input, shape index: {}]   ;;  %s1491_s8 = inlined_call_operand.vmem [shape: f32[1,256], index: 8, kind: input, shape index: {}]   ;;  %s1492_s9 = inlined_call_operand.hbm [shape: f32[8,128], index: 9, kind: output, shape index: {0}]   ;;  %s1493_s10 = inlined_call_operand.hbm [shape: f32[8,128], index: 10, kind: output, shape index: {1}]   ;;  %s1494_s11 = inlined_call_operand.hbm [shape: f32[8,256], index: 11, kind: output, shape index: {2}]  }
   0x1   :  { %18 = vsyncpa [#allocation6], 0 }
   0x2   :  { %19 = vsyncpa [#allocation9], 0 }
   0x3   :  { %20 = vsyncpa [#allocation4], 0 }
   0x4   :  { %21 = vsyncpa [#allocation13], 0  ;;  %s1324_s17 = smov [#allocation5]  }
   0x5   :  { %s37_s18 = sshll.u32 %s1324_s17, 4  ;;  %s38_s18 = int_to_ptr.vmem [resolvable:$true] %s37_s18 }
   0x6   :  { %s1162_s19 = scalar_lea.vmem %s38_s18, 16384  ;;  %p1167_p1 = scmp.lt.s32.totalorder %s38_s18, %s38_s18 }
   0x7   :  { %p1163_p0 = scmp.ne.s32.totalorder %s38_s18, %s1162_s19  ;;  %p1168_p2 = scmp.lt.s32.totalorder %s1162_s19, %s1162_s19 }
   0x9   :  { %p1169_p3 = por %p1168_p2, %p1167_p1 }
   0xb   :  { %p1170_p4 = pnand %p1169_p3, %p1163_p0 }
   0xd   :  { %1173 = shalt.err (!%p1170_p4)
}
   0xe   :  { %s1325_s20 = smov 128   ;;  %s1326_s21 = smov 8  }
   0xf   :  { %43 = dma.hbm_to_vmem [thread:$0]  %s1484_s1, 16384, %s38_s18, [#allocation6], %s1325_s20, %s1325_s20, %s1326_s21  }
  0x10   :  { %s1327_s24 = smov [#allocation8]   ;;  %s1328_s26 = smov [#allocation2]  }
  0x11   :  { %s65_s25 = sshll.u32 %s1327_s24, 4  ;;  %s28_s27 = sshll.u32 %s1328_s26, 4  ;;  %s66_s25 = int_to_ptr.vmem [resolvable:$true] %s65_s25  ;;  %s29_s27 = int_to_ptr.vmem [resolvable:$true] %s28_s27 }
  0x12   :  { %s1182_s28 = scalar_lea.vmem %s66_s25, 2048  ;;  %p1187_p6 = scmp.lt.s32.totalorder %s66_s25, %s66_s25 }
  0x13   :  { %p1183_p5 = scmp.ne.s32.totalorder %s66_s25, %s1182_s28  ;;  %p1188_p7 = scmp.lt.s32.totalorder %s1182_s28, %s1182_s28 }
  0x15   :  { %p1189_p8 = por %p1188_p7, %p1187_p6 }
  0x17   :  { %p1190_p9 = pnand %p1189_p8, %p1183_p5 }
  0x19   :  { %1193 = shalt.err (!%p1190_p9)
}
  0x1a   :  { %71 = dma.hbm_to_vmem [thread:$0]  %s1488_s5, 2048, %s66_s25, [#allocation9], %s1325_s20, %s1325_s20, %s1326_s21  }
  0x1b   :  { %s1202_s1 = scalar_lea.vmem %s29_s27, 1024  ;;  %p1207_p11 = scmp.lt.s32.totalorder %s29_s27, %s29_s27 }
  0x1c   :  { %p1203_p10 = scmp.ne.s32.totalorder %s29_s27, %s1202_s1  ;;  %p1208_p12 = scmp.lt.s32.totalorder %s1202_s1, %s1202_s1 }
  0x1e   :  { %p1209_p13 = por %p1208_p12, %p1207_p11 }
  0x20   :  { %p1210_p0 = pnand %p1209_p13, %p1203_p10 }
  0x22   :  { %1213 = shalt.err (!%p1210_p0)
}
  0x23   :  { %31 = dma.hbm_to_vmem [thread:$0]  %s1483_s0, 1024, %s29_s27, [#allocation3]  }
  0x24   :  { %s1329_s14 = smov [#allocation7]   ;;  %s1330_s16 = smov [#allocation10]  }
  0x25   :  { %s51_s15 = sshll.u32 %s1329_s14, 4  ;;  %s79_s17 = sshll.u32 %s1330_s16, 4  ;;  %s52_s15 = int_to_ptr.vmem [resolvable:$true] %s51_s15  ;;  %s80_s17 = int_to_ptr.vmem [resolvable:$true] %s79_s17 }
  0x26   :  { %s1222_s18 = scalar_lea.vmem %s52_s15, 2048  ;;  %p1227_p2 = scmp.lt.s32.totalorder %s52_s15, %s52_s15 }
  0x27   :  { %p1223_p1 = scmp.ne.s32.totalorder %s52_s15, %s1222_s18  ;;  %p1228_p3 = scmp.lt.s32.totalorder %s1222_s18, %s1222_s18 }
  0x29   :  { %p1229_p4 = por %p1228_p3, %p1227_p2 }
  0x2b   :  { %p1230_p5 = pnand %p1229_p4, %p1223_p1 }
  0x2d   :  { %1233 = shalt.err (!%p1230_p5)
}
  0x2e   :  { %57 = dma.hbm_to_vmem [thread:$0]  %s1486_s3, 2048, %s52_s15, [#allocation6], %s1325_s20, %s1325_s20, %s1326_s21  }
  0x2f   :  { %s1242_s0 = scalar_lea.vmem %s80_s17, 4096  ;;  %p1247_p7 = scmp.lt.s32.totalorder %s80_s17, %s80_s17 }
  0x30   :  { %p1243_p6 = scmp.ne.s32.totalorder %s80_s17, %s1242_s0  ;;  %p1248_p8 = scmp.lt.s32.totalorder %s1242_s0, %s1242_s0 }
  0x32   :  { %p1249_p9 = por %p1248_p8, %p1247_p7 }
  0x34   :  { %p1250_p10 = pnand %p1249_p9, %p1243_p6 }
  0x36   :  { %1253 = shalt.err (!%p1250_p10)
}
  0x37   :  { %s1331_s22 = smov 256   ;;  %s1332_s23 = smov 16  }
  0x38   :  { %85 = dma.hbm_to_vmem [thread:$0]  %s1490_s7, 4096, %s80_s17, [#allocation9], %s1331_s22, %s1331_s22, %s1332_s23  }
  0x39   :  { %1314 = dma.done.wait [#allocation3], 1024  }
  0x3a   :  { %1315 = vsyncadd [#allocation3], 4294966272 }
  0x3b   :  { %1316 = dma.done.wait [#allocation6], 18432  }
  0x3c   :  { %1317 = vsyncadd [#allocation6], 4294948864 }
  0x3d   :  { %1318 = dma.done.wait [#allocation9], 6144  }
  0x3e   :  { %1319 = vsyncadd [#allocation9], 4294961152  ;;  %v142_v0 = vld [vmem:[#allocation5 + $0xf8] sm:$0xff]  ;;  %v141_v4 = vld [vmem:[#allocation5 + $0xf0] sm:$0xff]  ;;  %vm1334_vm0 = vmmov 0   ;;  %s1335_s28 = smov [#allocation11]  }
  0x3f   :  { %v174_v1 = vld [vmem:[#allocation5 + $0x1f8] sm:$0xff]  ;;  %892 = vmatprep.subr.mxu0 %v142_v0  ;;  %v173_v5 = vld [vmem:[#allocation5 + $0x1f0] sm:$0xff]  ;;  %v140_v8 = vld [vmem:[#allocation5 + $0xe8] sm:$0xff] }
  0x40   :  { %v126_v2 = vld [vmem:[#allocation5 + $0x78] sm:$0xff]  ;;  %927 = vmatprep.subr.mxu1 %v174_v1  ;;  %v125_v6 = vld [vmem:[#allocation5 + $0x70] sm:$0xff]  ;;  %v172_v9 = vld [vmem:[#allocation5 + $0x1e8] sm:$0xff] }
  0x41   :  { %v158_v3 = vld [vmem:[#allocation5 + $0x178] sm:$0xff]  ;;  %893 = vmatpush3.msra.mxu0 %v126_v2  ;;  %v157_v7 = vld [vmem:[#allocation5 + $0x170] sm:$0xff]  ;;  %v124_v10 = vld [vmem:[#allocation5 + $0x68] sm:$0xff] }
  0x42   :  { %928 = vmatpush3.msra.mxu1 %v158_v3  ;;  %894 = vmatprep.subr.mxu0 %v141_v4  ;;  %v156_v11 = vld [vmem:[#allocation5 + $0x168] sm:$0xff]  ;;  %v139_v12 = vld [vmem:[#allocation5 + $0xe0] sm:$0xff]  ;;  %v138_v16 = vld [vmem:[#allocation5 + $0xd8] sm:$0xff] }
  0x43   :  { %929 = vmatprep.subr.mxu1 %v173_v5  ;;  %895 = vmatpush3.msra.mxu0 %v125_v6  ;;  %v171_v13 = vld [vmem:[#allocation5 + $0x1e0] sm:$0xff]  ;;  %v170_v17 = vld [vmem:[#allocation5 + $0x1d8] sm:$0xff]  ;;  %v137_v20 = vld [vmem:[#allocation5 + $0xd0] sm:$0xff] }
  0x44   :  { %930 = vmatpush3.msra.mxu1 %v157_v7  ;;  %896 = vmatprep.subr.mxu0 %v140_v8  ;;  %v123_v14 = vld [vmem:[#allocation5 + $0x60] sm:$0xff]  ;;  %v122_v18 = vld [vmem:[#allocation5 + $0x58] sm:$0xff]  ;;  %v169_v21 = vld [vmem:[#allocation5 + $0x1d0] sm:$0xff] }
  0x45   :  { %931 = vmatprep.subr.mxu1 %v172_v9  ;;  %v155_v15 = vld [vmem:[#allocation5 + $0x160] sm:$0xff]  ;;  %897 = vmatpush3.msra.mxu0 %v124_v10  ;;  %v154_v19 = vld [vmem:[#allocation5 + $0x158] sm:$0xff]  ;;  %v121_v22 = vld [vmem:[#allocation5 + $0x50] sm:$0xff] }
  0x46   :  { %932 = vmatpush3.msra.mxu1 %v156_v11  ;;  %898 = vmatprep.subr.mxu0 %v139_v12  ;;  %v153_v23 = vld [vmem:[#allocation5 + $0x150] sm:$0xff]  ;;  %v136_v24 = vld [vmem:[#allocation5 + $0xc8] sm:$0xff]  ;;  %v135_v28 = vld [vmem:[#allocation5 + $0xc0] sm:$0xff] }
  0x47   :  { %933 = vmatprep.subr.mxu1 %v171_v13  ;;  %899 = vmatpush3.msra.mxu0 %v123_v14  ;;  %v168_v25 = vld [vmem:[#allocation5 + $0x1c8] sm:$0xff]  ;;  %v167_v29 = vld [vmem:[#allocation5 + $0x1c0] sm:$0xff]  ;;  %v134_v32 = vld [vmem:[#allocation5 + $0xb8] sm:$0xff] }
  0x48   :  { %934 = vmatpush3.msra.mxu1 %v155_v15  ;;  %900 = vmatprep.subr.mxu0 %v138_v16  ;;  %v120_v26 = vld [vmem:[#allocation5 + $0x48] sm:$0xff]  ;;  %v119_v30 = vld [vmem:[#allocation5 + $0x40] sm:$0xff]  ;;  %v166_v33 = vld [vmem:[#allocation5 + $0x1b8] sm:$0xff] }
  0x49   :  { %935 = vmatprep.subr.mxu1 %v170_v17  ;;  %901 = vmatpush3.msra.mxu0 %v122_v18  ;;  %v152_v27 = vld [vmem:[#allocation5 + $0x148] sm:$0xff]  ;;  %v151_v31 = vld [vmem:[#allocation5 + $0x140] sm:$0xff]  ;;  %v118_v34 = vld [vmem:[#allocation5 + $0x38] sm:$0xff] }
  0x4a   :  { %936 = vmatpush3.msra.mxu1 %v154_v19  ;;  %902 = vmatprep.subr.mxu0 %v137_v20  ;;  %v150_v35 = vld [vmem:[#allocation5 + $0x138] sm:$0xff]  ;;  %v133_v36 = vld [vmem:[#allocation5 + $0xb0] sm:$0xff]  ;;  %v132_v40 = vld [vmem:[#allocation5 + $0xa8] sm:$0xff] }
  0x4b   :  { %937 = vmatprep.subr.mxu1 %v169_v21  ;;  %903 = vmatpush3.msra.mxu0 %v121_v22  ;;  %v165_v37 = vld [vmem:[#allocation5 + $0x1b0] sm:$0xff]  ;;  %v164_v41 = vld [vmem:[#allocation5 + $0x1a8] sm:$0xff]  ;;  %v131_v44 = vld [vmem:[#allocation5 + $0xa0] sm:$0xff] }
  0x4c   :  { %938 = vmatpush3.msra.mxu1 %v153_v23  ;;  %904 = vmatprep.subr.mxu0 %v136_v24  ;;  %v117_v38 = vld [vmem:[#allocation5 + $0x30] sm:$0xff]  ;;  %v116_v42 = vld [vmem:[#allocation5 + $0x28] sm:$0xff]  ;;  %v163_v45 = vld [vmem:[#allocation5 + $0x1a0] sm:$0xff] }
  0x4d   :  { %939 = vmatprep.subr.mxu1 %v168_v25  ;;  %905 = vmatpush3.msra.mxu0 %v120_v26  ;;  %v149_v39 = vld [vmem:[#allocation5 + $0x130] sm:$0xff]  ;;  %v148_v43 = vld [vmem:[#allocation5 + $0x128] sm:$0xff]  ;;  %v115_v46 = vld [vmem:[#allocation5 + $0x20] sm:$0xff] }
  0x4e   :  { %940 = vmatpush3.msra.mxu1 %v152_v27  ;;  %906 = vmatprep.subr.mxu0 %v135_v28  ;;  %v147_v47 = vld [vmem:[#allocation5 + $0x120] sm:$0xff]  ;;  %v130_v48 = vld [vmem:[#allocation5 + $0x98] sm:$0xff]  ;;  %v129_v52 = vld [vmem:[#allocation5 + $0x90] sm:$0xff] }
  0x4f   :  { %941 = vmatprep.subr.mxu1 %v167_v29  ;;  %907 = vmatpush3.msra.mxu0 %v119_v30  ;;  %v162_v49 = vld [vmem:[#allocation5 + $0x198] sm:$0xff]  ;;  %v161_v53 = vld [vmem:[#allocation5 + $0x190] sm:$0xff]  ;;  %v128_v56 = vld [vmem:[#allocation5 + $0x88] sm:$0xff] }
  0x50   :  { %942 = vmatpush3.msra.mxu1 %v151_v31  ;;  %908 = vmatprep.subr.mxu0 %v134_v32  ;;  %v114_v50 = vld [vmem:[#allocation5 + $0x18] sm:$0xff]  ;;  %v113_v54 = vld [vmem:[#allocation5 + $0x10] sm:$0xff]  ;;  %v160_v57 = vld [vmem:[#allocation5 + $0x188] sm:$0xff] }
  0x51   :  { %943 = vmatprep.subr.mxu1 %v166_v33  ;;  %909 = vmatpush3.msra.mxu0 %v118_v34  ;;  %v146_v51 = vld [vmem:[#allocation5 + $0x118] sm:$0xff]  ;;  %v145_v55 = vld [vmem:[#allocation5 + $0x110] sm:$0xff]  ;;  %v112_v58 = vld [vmem:[#allocation5 + $0x8] sm:$0xff] }
  0x52   :  { %944 = vmatpush3.msra.mxu1 %v150_v35  ;;  %910 = vmatprep.subr.mxu0 %v133_v36  ;;  %v144_v59 = vld [vmem:[#allocation5 + $0x108] sm:$0xff]  ;;  %v127_v60 = vld [vmem:[#allocation5 + $0x80] sm:$0xff]  ;;  %v106_v2 = vld [vmem:[#allocation2 + $0x18] sm:$0xff] }
  0x53   :  { %945 = vmatprep.subr.mxu1 %v165_v37  ;;  %911 = vmatpush3.msra.mxu0 %v117_v38  ;;  %v159_v61 = vld [vmem:[#allocation5 + $0x180] sm:$0xff]  ;;  %v104_v63 = vld [vmem:[#allocation2 + $0x8] sm:$0xff]  ;;  %v206_v3 = vld [vmem:[#allocation5 + $0x2f8] sm:$0xff] }
  0x54   :  { %946 = vmatpush3.msra.mxu1 %v149_v39  ;;  %912 = vmatprep.subr.mxu0 %v132_v40  ;;  %v111_v62 = vld [vmem:[#allocation5] sm:$0xff]  ;;  %v238_v4 = vld [vmem:[#allocation5 + $0x3f8] sm:$0xff]  ;;  %v105_v5 = vld [vmem:[#allocation2 + $0x10] sm:$0xff] }
  0x55   :  { %947 = vmatprep.subr.mxu1 %v164_v41  ;;  %913 = vmatpush3.msra.mxu0 %v116_v42  ;;  %v143_v0 = vld [vmem:[#allocation5 + $0x100] sm:$0xff]  ;;  %v190_v6 = vld [vmem:[#allocation5 + $0x278] sm:$0xff]  ;;  %v205_v8 = vld [vmem:[#allocation5 + $0x2f0] sm:$0xff] }
  0x56   :  { %948 = vmatpush3.msra.mxu1 %v148_v43  ;;  %914 = vmatprep.subr.mxu0 %v131_v44  ;;  %v103_v1 = vld [vmem:[#allocation2] sm:$0xff]  ;;  %v222_v7 = vld [vmem:[#allocation5 + $0x378] sm:$0xff]  ;;  %v237_v9 = vld [vmem:[#allocation5 + $0x3f0] sm:$0xff] }
  0x57   :  { %949 = vmatprep.subr.mxu1 %v163_v45  ;;  %915 = vmatpush3.msra.mxu0 %v115_v46  ;;  %v189_v10 = vld [vmem:[#allocation5 + $0x270] sm:$0xff]  ;;  %v204_v12 = vld [vmem:[#allocation5 + $0x2e8] sm:$0xff]  ;;  %v203_v16 = vld [vmem:[#allocation5 + $0x2e0] sm:$0xff] }
  0x58   :  { %950 = vmatpush3.msra.mxu1 %v147_v47  ;;  %916 = vmatprep.subr.mxu0 %v130_v48  ;;  %v221_v11 = vld [vmem:[#allocation5 + $0x370] sm:$0xff]  ;;  %v236_v13 = vld [vmem:[#allocation5 + $0x3e8] sm:$0xff]  ;;  %v235_v17 = vld [vmem:[#allocation5 + $0x3e0] sm:$0xff] }
  0x59   :  { %951 = vmatprep.subr.mxu1 %v162_v49  ;;  %917 = vmatpush3.msra.mxu0 %v114_v50  ;;  %v188_v14 = vld [vmem:[#allocation5 + $0x268] sm:$0xff]  ;;  %v187_v18 = vld [vmem:[#allocation5 + $0x260] sm:$0xff]  ;;  %v202_v20 = vld [vmem:[#allocation5 + $0x2d8] sm:$0xff] }
  0x5a   :  { %952 = vmatpush3.msra.mxu1 %v146_v51  ;;  %918 = vmatprep.subr.mxu0 %v129_v52  ;;  %v220_v15 = vld [vmem:[#allocation5 + $0x368] sm:$0xff]  ;;  %v219_v19 = vld [vmem:[#allocation5 + $0x360] sm:$0xff]  ;;  %v234_v21 = vld [vmem:[#allocation5 + $0x3d8] sm:$0xff] }
  0x5b   :  { %953 = vmatprep.subr.mxu1 %v161_v53  ;;  %919 = vmatpush3.msra.mxu0 %v113_v54  ;;  %v186_v22 = vld [vmem:[#allocation5 + $0x258] sm:$0xff]  ;;  %v201_v24 = vld [vmem:[#allocation5 + $0x2d0] sm:$0xff]  ;;  %v200_v28 = vld [vmem:[#allocation5 + $0x2c8] sm:$0xff] }
  0x5c   :  { %954 = vmatpush3.msra.mxu1 %v145_v55  ;;  %920 = vmatprep.subr.mxu0 %v128_v56  ;;  %v218_v23 = vld [vmem:[#allocation5 + $0x358] sm:$0xff]  ;;  %v233_v25 = vld [vmem:[#allocation5 + $0x3d0] sm:$0xff]  ;;  %v232_v29 = vld [vmem:[#allocation5 + $0x3c8] sm:$0xff] }
  0x5d   :  { %955 = vmatprep.subr.mxu1 %v160_v57  ;;  %921 = vmatpush3.msra.mxu0 %v112_v58  ;;  %v185_v26 = vld [vmem:[#allocation5 + $0x250] sm:$0xff]  ;;  %v184_v30 = vld [vmem:[#allocation5 + $0x248] sm:$0xff]  ;;  %v199_v32 = vld [vmem:[#allocation5 + $0x2c0] sm:$0xff] }
  0x5e   :  { %956 = vmatpush3.msra.mxu1 %v144_v59  ;;  %922 = vmatprep.subr.mxu0 %v127_v60  ;;  %v217_v27 = vld [vmem:[#allocation5 + $0x350] sm:$0xff]  ;;  %v216_v31 = vld [vmem:[#allocation5 + $0x348] sm:$0xff]  ;;  %v231_v33 = vld [vmem:[#allocation5 + $0x3c0] sm:$0xff] }
  0x5f   :  { %957 = vmatprep.subr.mxu1 %v159_v61  ;;  %923 = vmatpush3.msra.mxu0 %v111_v62  ;;  %v183_v34 = vld [vmem:[#allocation5 + $0x240] sm:$0xff]  ;;  %v198_v36 = vld [vmem:[#allocation5 + $0x2b8] sm:$0xff]  ;;  %v197_v40 = vld [vmem:[#allocation5 + $0x2b0] sm:$0xff] }
  0x60   :  { %310 = vmatprep.mubr.f32.mxu0 %v104_v63  ;;  %958 = vmatpush3.msra.mxu1 %v143_v0  ;;  %v215_v35 = vld [vmem:[#allocation5 + $0x340] sm:$0xff]  ;;  %v230_v37 = vld [vmem:[#allocation5 + $0x3b8] sm:$0xff]  ;;  %v229_v41 = vld [vmem:[#allocation5 + $0x3b0] sm:$0xff] }
  0x61   :  { %311 = vmatmul.mubr.f32.vlgmr.msra.gmra.mxu0 %v103_v1  ;;  %380 = vmatprep.mubr.f32.mxu1 %v106_v2  ;;  %v182_v38 = vld [vmem:[#allocation5 + $0x238] sm:$0xff]  ;;  %v181_v42 = vld [vmem:[#allocation5 + $0x230] sm:$0xff]  ;;  %v196_v44 = vld [vmem:[#allocation5 + $0x2a8] sm:$0xff] }
  0x62   :  { %962 = vmatprep.subr.mxu0 %v206_v3  ;;  %997 = vmatprep.subr.mxu1 %v238_v4  ;;  %v214_v39 = vld [vmem:[#allocation5 + $0x338] sm:$0xff]  ;;  %v213_v43 = vld [vmem:[#allocation5 + $0x330] sm:$0xff]  ;;  %v228_v45 = vld [vmem:[#allocation5 + $0x3a8] sm:$0xff] }
  0x63   :  { %381 = vmatmul.mubr.f32.vlgmr.msra.gmra.mxu1 %v105_v5  ;;  %963 = vmatpush3.msra.mxu0 %v190_v6  ;;  %v180_v46 = vld [vmem:[#allocation5 + $0x228] sm:$0xff]  ;;  %v195_v48 = vld [vmem:[#allocation5 + $0x2a0] sm:$0xff]  ;;  %v194_v52 = vld [vmem:[#allocation5 + $0x298] sm:$0xff] }
  0x64   :  { %998 = vmatpush3.msra.mxu1 %v222_v7  ;;  %964 = vmatprep.subr.mxu0 %v205_v8  ;;  %v212_v47 = vld [vmem:[#allocation5 + $0x328] sm:$0xff]  ;;  %v227_v49 = vld [vmem:[#allocation5 + $0x3a0] sm:$0xff]  ;;  %v226_v53 = vld [vmem:[#allocation5 + $0x398] sm:$0xff] }
  0x65   :  { %999 = vmatprep.subr.mxu1 %v237_v9  ;;  %965 = vmatpush3.msra.mxu0 %v189_v10  ;;  %v179_v50 = vld [vmem:[#allocation5 + $0x220] sm:$0xff]  ;;  %v178_v54 = vld [vmem:[#allocation5 + $0x218] sm:$0xff]  ;;  %v193_v56 = vld [vmem:[#allocation5 + $0x290] sm:$0xff]  ;;  %v1333_v9 = vmov 0.0  }
  0x66   :  { %1000 = vmatpush3.msra.mxu1 %v221_v11  ;;  %966 = vmatprep.subr.mxu0 %v204_v12  ;;  %v211_v51 = vld [vmem:[#allocation5 + $0x320] sm:$0xff]  ;;  %v210_v55 = vld [vmem:[#allocation5 + $0x318] sm:$0xff]  ;;  %v225_v57 = vld [vmem:[#allocation5 + $0x390] sm:$0xff] }
  0x67   :  { %1001 = vmatprep.subr.mxu1 %v236_v13  ;;  %967 = vmatpush3.msra.mxu0 %v188_v14  ;;  %v177_v58 = vld [vmem:[#allocation5 + $0x210] sm:$0xff]  ;;  %v192_v60 = vld [vmem:[#allocation5 + $0x288] sm:$0xff]  ;;  %v191_v0 = vld [vmem:[#allocation5 + $0x280] sm:$0xff] }
  0x68   :  { %1002 = vmatpush3.msra.mxu1 %v220_v15  ;;  %968 = vmatprep.subr.mxu0 %v203_v16  ;;  %v209_v59 = vld [vmem:[#allocation5 + $0x310] sm:$0xff]  ;;  %v224_v61 = vld [vmem:[#allocation5 + $0x388] sm:$0xff]  ;;  %v223_v1 = vld [vmem:[#allocation5 + $0x380] sm:$0xff] }
  0x69   :  { %1003 = vmatprep.subr.mxu1 %v235_v17  ;;  %969 = vmatpush3.msra.mxu0 %v187_v18  ;;  %v176_v62 = vld [vmem:[#allocation5 + $0x208] sm:$0xff]  ;;  %v175_v2 = vld [vmem:[#allocation5 + $0x200] sm:$0xff]  ;;  %v110_v5 = vld [vmem:[#allocation2 + $0x38] sm:$0xff] }
  0x6a   :  { %1004 = vmatpush3.msra.mxu1 %v219_v19  ;;  %970 = vmatprep.subr.mxu0 %v202_v20  ;;  %v208_v63 = vld [vmem:[#allocation5 + $0x308] sm:$0xff]  ;;  %v207_v4 = vld [vmem:[#allocation5 + $0x300] sm:$0xff]  ;;  %v109_v7 = vld [vmem:[#allocation2 + $0x30] sm:$0xff] }
  0x6b   :  { %1005 = vmatprep.subr.mxu1 %v234_v21  ;;  %971 = vmatpush3.msra.mxu0 %v186_v22  ;;  %v108_v3 = vld [vmem:[#allocation2 + $0x28] sm:$0xff]  ;;  %v107_v6 = vld [vmem:[#allocation2 + $0x20] sm:$0xff]  ;;  %v541_v8 = vld [vmem:[#allocation7 + $0x78] sm:$0xff] }
  0x6c   :  { %1006 = vmatpush3.msra.mxu1 %v218_v23  ;;  %972 = vmatprep.subr.mxu0 %v201_v24  ;;  %v540_v10 = vld [vmem:[#allocation7 + $0x70] sm:$0xff]  ;;  %v539_v11 = vld [vmem:[#allocation7 + $0x68] sm:$0xff]  ;;  %v538_v12 = vld [vmem:[#allocation7 + $0x60] sm:$0xff] }
  0x6d   :  { %1007 = vmatprep.subr.mxu1 %v233_v25  ;;  %973 = vmatpush3.msra.mxu0 %v185_v26  ;;  %v537_v13 = vld [vmem:[#allocation7 + $0x58] sm:$0xff]  ;;  %v536_v14 = vld [vmem:[#allocation7 + $0x50] sm:$0xff]  ;;  %v535_v15 = vld [vmem:[#allocation7 + $0x48] sm:$0xff] }
  0x6e   :  { %1008 = vmatpush3.msra.mxu1 %v217_v27  ;;  %974 = vmatprep.subr.mxu0 %v200_v28  ;;  %v534_v16 = vld [vmem:[#allocation7 + $0x40] sm:$0xff]  ;;  %v533_v17 = vld [vmem:[#allocation7 + $0x38] sm:$0xff]  ;;  %v532_v18 = vld [vmem:[#allocation7 + $0x30] sm:$0xff] }
  0x6f   :  { %1009 = vmatprep.subr.mxu1 %v232_v29  ;;  %975 = vmatpush3.msra.mxu0 %v184_v30  ;;  %v531_v19 = vld [vmem:[#allocation7 + $0x28] sm:$0xff]  ;;  %v530_v20 = vld [vmem:[#allocation7 + $0x20] sm:$0xff]  ;;  %v529_v21 = vld [vmem:[#allocation7 + $0x18] sm:$0xff] }
  0x70   :  { %1010 = vmatpush3.msra.mxu1 %v216_v31  ;;  %976 = vmatprep.subr.mxu0 %v199_v32  ;;  %v528_v22 = vld [vmem:[#allocation7 + $0x10] sm:$0xff]  ;;  %v527_v23 = vld [vmem:[#allocation7 + $0x8] sm:$0xff]  ;;  %v526_v24 = vld [vmem:[#allocation7] sm:$0xff] }
  0x71   :  { %1011 = vmatprep.subr.mxu1 %v231_v33  ;;  %977 = vmatpush3.msra.mxu0 %v183_v34  ;;  %v757_v25 = vld [vmem:[#allocation10 + $0xf8] sm:$0xff]  ;;  %v634_v27 = vld [vmem:[#allocation8 + $0x70] sm:$0xff]  ;;  %v633_v28 = vld [vmem:[#allocation8 + $0x68] sm:$0xff] }
  0x72   :  { %1012 = vmatpush3.msra.mxu1 %v215_v35  ;;  %978 = vmatprep.subr.mxu0 %v198_v36  ;;  %v635_v26 = vld [vmem:[#allocation8 + $0x78] sm:$0xff]  ;;  %v632_v29 = vld [vmem:[#allocation8 + $0x60] sm:$0xff]  ;;  %v630_v31 = vld [vmem:[#allocation8 + $0x50] sm:$0xff] }
  0x73   :  { %1013 = vmatprep.subr.mxu1 %v230_v37  ;;  %979 = vmatpush3.msra.mxu0 %v182_v38  ;;  %v631_v30 = vld [vmem:[#allocation8 + $0x58] sm:$0xff]  ;;  %v629_v32 = vld [vmem:[#allocation8 + $0x48] sm:$0xff]  ;;  %v628_v33 = vld [vmem:[#allocation8 + $0x40] sm:$0xff] }
  0x74   :  { %1014 = vmatpush3.msra.mxu1 %v214_v39  ;;  %980 = vmatprep.subr.mxu0 %v197_v40  ;;  %v627_v34 = vld [vmem:[#allocation8 + $0x38] sm:$0xff]  ;;  %v626_v35 = vld [vmem:[#allocation8 + $0x30] sm:$0xff]  ;;  %v625_v36 = vld [vmem:[#allocation8 + $0x28] sm:$0xff] }
  0x75   :  { %1015 = vmatprep.subr.mxu1 %v229_v41  ;;  %981 = vmatpush3.msra.mxu0 %v181_v42  ;;  %v624_v37 = vld [vmem:[#allocation8 + $0x20] sm:$0xff]  ;;  %v623_v38 = vld [vmem:[#allocation8 + $0x18] sm:$0xff] }
  0x76   :  { %1016 = vmatpush3.msra.mxu1 %v213_v43  ;;  %982 = vmatprep.subr.mxu0 %v196_v44  ;;  %v889_v43 = vld [vmem:[%s1485_s2] ss:$0 sm:$0xff] }
  0x77   :  { %1017 = vmatprep.subr.mxu1 %v228_v45  ;;  %983 = vmatpush3.msra.mxu0 %v180_v46 }
  0x78   :  { %1018 = vmatpush3.msra.mxu1 %v212_v47  ;;  %984 = vmatprep.subr.mxu0 %v195_v48 }
  0x79   :  { %1019 = vmatprep.subr.mxu1 %v227_v49  ;;  %985 = vmatpush3.msra.mxu0 %v179_v50 }
  0x7a   :  { %1020 = vmatpush3.msra.mxu1 %v211_v51  ;;  %986 = vmatprep.subr.mxu0 %v194_v52 }
  0x7b   :  { %1021 = vmatprep.subr.mxu1 %v226_v53  ;;  %987 = vmatpush3.msra.mxu0 %v178_v54 }
  0x7c   :  { %1022 = vmatpush3.msra.mxu1 %v210_v55  ;;  %988 = vmatprep.subr.mxu0 %v193_v56  ;;  %v756_v56 = vld [vmem:[#allocation10 + $0xf0] sm:$0xff] }
  0x7d   :  { %1023 = vmatprep.subr.mxu1 %v225_v57  ;;  %989 = vmatpush3.msra.mxu0 %v177_v58  ;;  %v755_v57 = vld [vmem:[#allocation10 + $0xe8] sm:$0xff]  ;;  %v754_v58 = vld [vmem:[#allocation10 + $0xe0] sm:$0xff] }
  0x7e   :  { %1024 = vmatpush3.msra.mxu1 %v209_v59  ;;  %990 = vmatprep.subr.mxu0 %v192_v60  ;;  %v753_v59 = vld [vmem:[#allocation10 + $0xd8] sm:$0xff]  ;;  %v752_v60 = vld [vmem:[#allocation10 + $0xd0] sm:$0xff] }
  0x7f   :  { %1025 = vmatprep.subr.mxu1 %v224_v61  ;;  %991 = vmatpush3.msra.mxu0 %v176_v62  ;;  %v751_v61 = vld [vmem:[#allocation10 + $0xc8] sm:$0xff]  ;;  %v750_v62 = vld [vmem:[#allocation10 + $0xc0] sm:$0xff] }
  0x80   :  { %1026 = vmatpush3.msra.mxu1 %v208_v63  ;;  %992 = vmatprep.subr.mxu0 %v191_v0  ;;  %v749_v63 = vld [vmem:[#allocation10 + $0xb8] sm:$0xff]  ;;  %v748_v0 = vld [vmem:[#allocation10 + $0xb0] sm:$0xff] }
  0x81   :  { %1027 = vmatprep.subr.mxu1 %v223_v1  ;;  %993 = vmatpush3.msra.mxu0 %v175_v2  ;;  %v747_v1 = vld [vmem:[#allocation10 + $0xa8] sm:$0xff]  ;;  %v746_v2 = vld [vmem:[#allocation10 + $0xa0] sm:$0xff] }
  0x82   :  { %450 = vmatprep.mubr.f32.mxu0 %v108_v3  ;;  %1028 = vmatpush3.msra.mxu1 %v207_v4  ;;  %v745_v3 = vld [vmem:[#allocation10 + $0x98] sm:$0xff]  ;;  %v744_v4 = vld [vmem:[#allocation10 + $0x90] sm:$0xff] }
  0x83   :  { %520 = vmatprep.mubr.f32.mxu1 %v110_v5  ;;  %451 = vmatmul.mubr.f32.vlgmr.msra.gmra.mxu0 %v107_v6  ;;  %v743_v5 = vld [vmem:[#allocation10 + $0x88] sm:$0xff]  ;;  %v742_v6 = vld [vmem:[#allocation10 + $0x80] sm:$0xff] }
  0x84   :  { %521 = vmatmul.mubr.f32.vlgmr.msra.gmra.mxu1 %v109_v7  ;;  %1066 = vmatprep.subr.mxu0 %v1333_v9  ;;  %v741_v7 = vld [vmem:[#allocation10 + $0x78] sm:$0xff] }
  0x85   :  { %1101 = vmatprep.subr.mxu1 %v1333_v9  ;;  %1067 = vmatpush3.msra.mxu0 %v541_v8  ;;  %v740_v8 = vld [vmem:[#allocation10 + $0x70] sm:$0xff] }
  0x86   :  { %1068 = vmatprep.subr.mxu0 %v1333_v9  ;;  %1098 = vmatprep.mubr.msk.f32.mxu0 %vm1334_vm0, %v1333_v9 }
  0x87   :  { %1069 = vmatpush3.msra.mxu0 %v540_v10  ;;  %1133 = vmatprep.mubr.msk.f32.mxu1 %vm1334_vm0, %v1333_v9  ;;  %v739_v10 = vld [vmem:[#allocation10 + $0x68] sm:$0xff] }
  0x88   :  { %1070 = vmatprep.subr.mxu0 %v1333_v9  ;;  %1102 = vmatpush3.msra.mxu1 %v635_v26  ;;  %v620_v26 = vld [vmem:[#allocation8] sm:$0xff] }
  0x89   :  { %1071 = vmatpush3.msra.mxu0 %v539_v11  ;;  %1103 = vmatprep.subr.mxu1 %v1333_v9  ;;  %v738_v11 = vld [vmem:[#allocation10 + $0x60] sm:$0xff] }
  0x8a   :  { %1072 = vmatprep.subr.mxu0 %v1333_v9  ;;  %1104 = vmatpush3.msra.mxu1 %v634_v27  ;;  %v890_v27 = vld [vmem:[%s1487_s4] ss:$0 sm:$0xff] }
  0x8b   :  { %1073 = vmatpush3.msra.mxu0 %v538_v12  ;;  %1105 = vmatprep.subr.mxu1 %v1333_v9  ;;  %v737_v12 = vld [vmem:[#allocation10 + $0x58] sm:$0xff] }
  0x8c   :  { %1074 = vmatprep.subr.mxu0 %v1333_v9  ;;  %1106 = vmatpush3.msra.mxu1 %v633_v28 }
  0x8d   :  { %1075 = vmatpush3.msra.mxu0 %v537_v13  ;;  %1107 = vmatprep.subr.mxu1 %v1333_v9  ;;  %v736_v13 = vld [vmem:[#allocation10 + $0x50] sm:$0xff] }
  0x8e   :  { %1076 = vmatprep.subr.mxu0 %v1333_v9  ;;  %1108 = vmatpush3.msra.mxu1 %v632_v29 }
  0x8f   :  { %1077 = vmatpush3.msra.mxu0 %v536_v14  ;;  %1109 = vmatprep.subr.mxu1 %v1333_v9  ;;  %v735_v14 = vld [vmem:[#allocation10 + $0x48] sm:$0xff] }
  0x90   :  { %1078 = vmatprep.subr.mxu0 %v1333_v9  ;;  %1110 = vmatpush3.msra.mxu1 %v631_v30 }
  0x91   :  { %1079 = vmatpush3.msra.mxu0 %v535_v15  ;;  %1111 = vmatprep.subr.mxu1 %v1333_v9  ;;  %v734_v15 = vld [vmem:[#allocation10 + $0x40] sm:$0xff] }
  0x92   :  { %1080 = vmatprep.subr.mxu0 %v1333_v9  ;;  %1112 = vmatpush3.msra.mxu1 %v630_v31 }
  0x93   :  { %1081 = vmatpush3.msra.mxu0 %v534_v16  ;;  %1113 = vmatprep.subr.mxu1 %v1333_v9  ;;  %v733_v16 = vld [vmem:[#allocation10 + $0x38] sm:$0xff] }
  0x94   :  { %1082 = vmatprep.subr.mxu0 %v1333_v9  ;;  %1114 = vmatpush3.msra.mxu1 %v629_v32  ;;  %v760_v32 = vlaneseq }
  0x95   :  { %1083 = vmatpush3.msra.mxu0 %v533_v17  ;;  %1115 = vmatprep.subr.mxu1 %v1333_v9  ;;  %v732_v17 = vld [vmem:[#allocation10 + $0x30] sm:$0xff] }
  0x96   :  { %1084 = vmatprep.subr.mxu0 %v1333_v9  ;;  %1116 = vmatpush3.msra.mxu1 %v628_v33  ;;  %v761_v33 = vshrl.u32 %v760_v32, 7 }
  0x97   :  { %1085 = vmatpush3.msra.mxu0 %v532_v18  ;;  %1117 = vmatprep.subr.mxu1 %v1333_v9  ;;  %v731_v18 = vld [vmem:[#allocation10 + $0x28] sm:$0xff] }
  0x98   :  { %1086 = vmatprep.subr.mxu0 %v1333_v9  ;;  %1118 = vmatpush3.msra.mxu1 %v627_v34  ;;  %v762_v34 = vsub.s32 0, %v761_v33 }
  0x99   :  { %1087 = vmatpush3.msra.mxu0 %v531_v19  ;;  %1119 = vmatprep.subr.mxu1 %v1333_v9  ;;  %v730_v19 = vld [vmem:[#allocation10 + $0x20] sm:$0xff] }
  0x9a   :  { %1088 = vmatprep.subr.mxu0 %v1333_v9  ;;  %1120 = vmatpush3.msra.mxu1 %v626_v35  ;;  %v758_v35 = vld [vmem:[%s1491_s8] sm:$0x3]  ;;  %s851_s8 = sshll.u32 %s1335_s28, 4  ;;  %s852_s8 = int_to_ptr.vmem [resolvable:$true] %s851_s8 }
  0x9b   :  { %1089 = vmatpush3.msra.mxu0 %v530_v20  ;;  %1121 = vmatprep.subr.mxu1 %v1333_v9  ;;  %v729_v20 = vld [vmem:[#allocation10 + $0x18] sm:$0xff]  ;;  %s1254_s29 = scalar_lea.vmem %s852_s8, 128  ;;  %p1259_p12 = scmp.lt.s32.totalorder %s852_s8, %s852_s8 }
  0x9c   :  { %1090 = vmatprep.subr.mxu0 %v1333_v9  ;;  %1122 = vmatpush3.msra.mxu1 %v625_v36  ;;  %v766_v36 = vsub.s32 1, %v761_v33  ;;  %p1255_p11 = scmp.ne.s32.totalorder %s852_s8, %s1254_s29  ;;  %p1260_p13 = scmp.lt.s32.totalorder %s1254_s29, %s1254_s29 }
  0x9d   :  { %1091 = vmatpush3.msra.mxu0 %v529_v21  ;;  %1123 = vmatprep.subr.mxu1 %v1333_v9  ;;  %v728_v21 = vld [vmem:[#allocation10 + $0x10] sm:$0xff] }
  0x9e   :  { %1092 = vmatprep.subr.mxu0 %v1333_v9  ;;  %1124 = vmatpush3.msra.mxu1 %v624_v37  ;;  %v763_v37 = vrot.slane %v758_v35, %v762_v34  ;;  %p1261_p0 = por %p1260_p13, %p1259_p12 }
  0x9f   :  { %1093 = vmatpush3.msra.mxu0 %v528_v22  ;;  %1125 = vmatprep.subr.mxu1 %v1333_v9  ;;  %v727_v22 = vld [vmem:[#allocation10 + $0x8] sm:$0xff] }
  0xa0   :  { %1094 = vmatprep.subr.mxu0 %v1333_v9  ;;  %1126 = vmatpush3.msra.mxu1 %v623_v38  ;;  %p1262_p1 = pnand %p1261_p0, %p1255_p11 }
  0xa1   :  { %1095 = vmatpush3.msra.mxu0 %v527_v23  ;;  %1127 = vmatprep.subr.mxu1 %v1333_v9  ;;  %v726_v23 = vld [vmem:[#allocation10] sm:$0xff] }
  0xa2   :  { %1096 = vmatprep.subr.mxu0 %v1333_v9 }
  0xa3   :  { %1097 = vmatpush3.msra.mxu0 %v526_v24  ;;  %v622_v24 = vld [vmem:[#allocation8 + $0x10] sm:$0xff] }
  0xa4   :  { %770 = vmatprep.subr.mxu0 %v757_v25  ;;  %1128 = vmatpush3.msra.mxu1 %v622_v24  ;;  %v621_v25 = vld [vmem:[#allocation8 + $0x8] sm:$0xff] }
  0xa5   :  { %1129 = vmatprep.subr.mxu1 %v1333_v9 }
  0xa6   :  { %1130 = vmatpush3.msra.mxu1 %v621_v25 }
  0xa7   :  { %1131 = vmatprep.subr.mxu1 %v1333_v9 }
  0xa8   :  { %1132 = vmatpush3.msra.mxu1 %v620_v26 }
 0x121   :  { %v924_v39 = vpop.f32.mrf.mxu0 }
 0x123   :  { %v959_v40 = vpop.f32.mrf.mxu1  ;;  %v925_v41 = vpop.f32.mrf.mxu0 }
 0x124   :  { %v926_v42 = vadd.f32 %v925_v41, %v924_v39 }
 0x125   :  { %v960_v44 = vpop.f32.mrf.mxu1 }
 0x126   :  { %v313_v45 = vadd.f32 %v926_v42, %v889_v43  ;;  %v961_v46 = vadd.f32 %v960_v44, %v959_v40  ;;  %v891_v42 = vld [vmem:[%s1489_s6] ss:$0 sm:$0xff] }
 0x128   :  { %v383_v51 = vadd.f32 %v961_v46, %v313_v45 }
 0x143   :  { %v994_v47 = vpop.f32.mrf.mxu0 }
 0x144   :  { %v1029_v48 = vpop.f32.mrf.mxu1 }
 0x145   :  { %v995_v49 = vpop.f32.mrf.mxu0 }
 0x146   :  { %v1030_v50 = vpop.f32.mrf.mxu1  ;;  %v996_v52 = vadd.f32 %v995_v49, %v994_v47 }
 0x147   :  { %v1031_v54 = vadd.f32 %v1030_v50, %v1029_v48 }
 0x148   :  { %v453_v53 = vadd.f32 %v996_v52, %v383_v51 }
 0x14a   :  { %v1457_v55 = vadd.f32 %v1031_v54, %v453_v53 }
 0x14c   :  { %841 = vst [vmem:[#allocation11] sm:$0xff] %v1457_v55  ;;  %1099 = vmatmul.mubr.f32.vlgmr.msra.gmra.mxu0 %v1457_v55 }
 0x14d   :  { %771 = vmatpush1.msra.mxu0 %v756_v56  ;;  %834 = vmatprep.mubr.f32.mxu0 %v1333_v9  ;;  %v767_v9 = vrot.slane %v758_v35, %v766_v36 }
 0x14e   :  { %772 = vmatprep.subr.mxu0 %v755_v57 }
 0x14f   :  { %773 = vmatpush1.msra.mxu0 %v754_v58 }
 0x150   :  { %774 = vmatprep.subr.mxu0 %v753_v59 }
 0x151   :  { %775 = vmatpush1.msra.mxu0 %v752_v60 }
 0x152   :  { %776 = vmatprep.subr.mxu0 %v751_v61 }
 0x153   :  { %777 = vmatpush1.msra.mxu0 %v750_v62 }
 0x154   :  { %778 = vmatprep.subr.mxu0 %v749_v63 }
 0x155   :  { %779 = vmatpush1.msra.mxu0 %v748_v0 }
 0x156   :  { %780 = vmatprep.subr.mxu0 %v747_v1 }
 0x157   :  { %781 = vmatpush1.msra.mxu0 %v746_v2 }
 0x158   :  { %782 = vmatprep.subr.mxu0 %v745_v3 }
 0x159   :  { %783 = vmatpush1.msra.mxu0 %v744_v4 }
 0x15a   :  { %784 = vmatprep.subr.mxu0 %v743_v5 }
 0x15b   :  { %785 = vmatpush1.msra.mxu0 %v742_v6 }
 0x15c   :  { %786 = vmatprep.subr.mxu0 %v741_v7 }
 0x15d   :  { %787 = vmatpush1.msra.mxu0 %v740_v8 }
 0x15e   :  { %788 = vmatprep.subr.mxu0 %v739_v10 }
 0x15f   :  { %789 = vmatpush1.msra.mxu0 %v738_v11 }
 0x160   :  { %790 = vmatprep.subr.mxu0 %v737_v12 }
 0x161   :  { %791 = vmatpush1.msra.mxu0 %v736_v13 }
 0x162   :  { %792 = vmatprep.subr.mxu0 %v735_v14 }
 0x163   :  { %793 = vmatpush1.msra.mxu0 %v734_v15 }
 0x164   :  { %794 = vmatprep.subr.mxu0 %v733_v16 }
 0x165   :  { %795 = vmatpush1.msra.mxu0 %v732_v17 }
 0x166   :  { %796 = vmatprep.subr.mxu0 %v731_v18 }
 0x167   :  { %797 = vmatpush1.msra.mxu0 %v730_v19 }
 0x168   :  { %798 = vmatprep.subr.mxu0 %v729_v20 }
 0x169   :  { %799 = vmatpush1.msra.mxu0 %v728_v21 }
 0x16a   :  { %800 = vmatprep.subr.mxu0 %v727_v22 }
 0x16b   :  { %801 = vmatpush1.msra.mxu0 %v726_v23 }
 0x16c   :  { %835 = vmatmul.mubr.f32.vlgmr.msra.gmra.mxu0 %v1457_v55 }
 0x20c   :  { %v615_v28 = vpop.f32.mrf.mxu0 }
 0x20d   :  { %v616_v29 = vadd.f32 %v890_v27, %v615_v28 }
 0x20e   :  { %v1100_v30 = vpop.f32.mrf.mxu0 }
 0x20f   :  { %v619_v31 = vmax.f32 %v616_v29, 0.0 }
 0x211   :  { %1134 = vmatmul.mubr.f32.vlgmr.msra.gmra.mxu1 %v619_v31 }
 0x22c   :  { %v836_v38 = vpop.f32.mrf.mxu0 }
 0x22d   :  { %v837_v39 = vadd.f32 %v836_v38, %v763_v37 }
 0x22e   :  { %v838_v40 = vpop.f32.mrf.mxu0 }
 0x22f   :  { %843 = vst [vmem:[#allocation14] sm:$0xff] %v837_v39  ;;  %v839_v41 = vadd.f32 %v838_v40, %v767_v9 }
 0x231   :  { %844 = vst [vmem:[#allocation14 + $0x8] sm:$0xff] %v839_v41 }
 0x2d1   :  { %v709_v43 = vpop.f32.mrf.mxu1 }
 0x2d2   :  { %v710_v44 = vadd.f32 %v891_v42, %v709_v43 }
 0x2d3   :  { %v1135_v45 = vpop.f32.mrf.mxu1 }
 0x2d4   :  { %v713_v46 = vmul.f32 %v710_v44, %v710_v44 }
 0x2d6   :  { %714 = vadd.xlane.f32.xlu0 %v713_v46 }
 0x2d7   :  { %1265 = shalt.err (!%p1262_p1)
}
 0x2d8   :  { %854 = dma.vmem_to_hbm [thread:$0]  %s852_s8, 128, %s1492_s9, [#allocation4]  }
 0x2d9   :  { %s1336_s6 = smov [#allocation12]   ;;  %s1337_s13 = smov [#allocation14]  }
 0x2da   :  { %s861_s12 = sshll.u32 %s1336_s6, 4  ;;  %s871_s14 = sshll.u32 %s1337_s13, 4  ;;  %s862_s12 = int_to_ptr.vmem [resolvable:$true] %s861_s12  ;;  %s872_s14 = int_to_ptr.vmem [resolvable:$true] %s871_s14 }
 0x2db   :  { %s1274_s9 = scalar_lea.vmem %s862_s12, 128  ;;  %p1279_p3 = scmp.lt.s32.totalorder %s862_s12, %s862_s12 }
 0x2dc   :  { %p1275_p2 = scmp.ne.s32.totalorder %s862_s12, %s1274_s9  ;;  %p1280_p4 = scmp.lt.s32.totalorder %s1274_s9, %s1274_s9 }
 0x2de   :  { %p1281_p5 = por %p1280_p4, %p1279_p3 }
 0x2e0   :  { %p1282_p6 = pnand %p1281_p5, %p1275_p2 }
 0x35f   :  { %v715_v47 = vpop.xlane.xlu0 %714 }
 0x360   :  { %1150 = vrsqrt.f32 %v715_v47  ;;  %vm718_vm1 = vcmp.eq.f32.partialorder %v715_v47, inf  ;;  %v721_v50 = vand.u32 2147483648, %v715_v47  ;;  %vm720_vm2 = vcmp.eq.f32.partialorder %v715_v47, 0.0 }
 0x36d   :  { %v1151_v48 = vpop.eup %1150 }
 0x36e   :  { %v717_v49 = vmul.f32 %v1151_v48, %v715_v47 }
 0x370   :  { %v719_v51 = vsel %vm718_vm1, %v715_v47, %v717_v49 }
 0x371   :  { %v722_v52 = vsel %vm720_vm2, %v721_v50, %v719_v51 }
 0x372   :  { %v723_v53 = vmax.f32 %v722_v52, 1e-12 }
 0x374   :  { %1152 = vrcp.f32 %v723_v53 }
 0x381   :  { %v1153_v54 = vpop.eup %1152 }
 0x382   :  { %v725_v55 = vmul.f32 %v1153_v54, %v710_v44 }
 0x384   :  { %842 = vst [vmem:[#allocation12] sm:$0xff] %v725_v55 }
 0x385   :  { %1285 = shalt.err (!%p1282_p6)
}
 0x386   :  { %864 = dma.vmem_to_hbm [thread:$0]  %s862_s12, 128, %s1493_s10, [#allocation13]  }
 0x387   :  { %s1294_s17 = scalar_lea.vmem %s872_s14, 256  ;;  %p1299_p8 = scmp.lt.s32.totalorder %s872_s14, %s872_s14 }
 0x388   :  { %p1295_p7 = scmp.ne.s32.totalorder %s872_s14, %s1294_s17  ;;  %p1300_p9 = scmp.lt.s32.totalorder %s1294_s17, %s1294_s17 }
 0x38a   :  { %p1301_p10 = por %p1300_p9, %p1299_p8 }
 0x38c   :  { %p1302_p11 = pnand %p1301_p10, %p1295_p7 }
 0x38e   :  { %1305 = shalt.err (!%p1302_p11)
}
 0x38f   :  { %874 = dma.vmem_to_hbm [thread:$0]  %s872_s14, 256, %s1494_s11, [#allocation13]  }
 0x390   :  { %1320 = dma.done.wait [#allocation4], 128  }
 0x391   :  { %1321 = vsyncadd [#allocation4], 4294967168 }
 0x392   :  { %1322 = dma.done.wait [#allocation13], 384  }
 0x393   :  { %1323 = vsyncadd [#allocation13], 4294966912 }
 0x394   :  { %884 = vsyncpa [#allocation3], 1 }
 0x395   :  { %885 = vsyncpa [#allocation6], 1 }
 0x396   :  { %886 = vsyncpa [#allocation9], 1 }
 0x397   :  { %887 = vsyncpa [#allocation4], 1 }
 0x398   :  { %888 = vsyncpa [#allocation13], 1 }

</bundles_post_ra>
